<compile_context>
chip_gen: v5e
topology: v5e:2x2
jax: 0.10.0
libtpu: 0.0.40
codegen_flags: <defaults>
</compile_context>

<pallas_src>
import jax
import jax.numpy as jnp
from jax.experimental import pallas as pl
from jax.experimental.pallas import tpu as pltpu


LANES = 128
DEFAULT_BLOCK_N = 64    # gathered rows per grid step (amortizes step overhead,
                        # keeps <=64 outstanding row DMAs per step)


def _round_up(x, m):
    return ((x + m - 1) // m) * m


def _make_gather_kernel(block_n):
    """Row-gather kernel: DMA block_n table rows from HBM into one output tile."""

    def kernel(gidx_ref, tbl_ref, out_ref, buf_ref, sem_ref):
        # gidx_ref : SMEM int32 (G,)            -- scalar-prefetched global row ids
        # tbl_ref  : HBM  (sum(V_t), D_pad)     -- row-packed tables (pl.ANY)
        # out_ref  : VMEM (block_n, D_pad)      -- lane-dense output tile
        # buf_ref  : VMEM (block_n, D_pad)      -- DMA staging buffer
        # sem_ref  : DMA semaphores (block_n,)
        base = pl.program_id(0) * block_n

        # Issue all row fetches first so their HBM latencies overlap, then wait.
        copies = []
        for j in range(block_n):                       # static unroll
            row = gidx_ref[base + j]                   # scalar read from SMEM
            cp = pltpu.make_async_copy(
                tbl_ref.at[pl.ds(row, 1), :],
                buf_ref.at[pl.ds(j, 1), :],
                sem_ref.at[j],
            )
            cp.start()
            copies.append(cp)
        for cp in copies:
            cp.wait()

        # Single full-width lane-dense store; the pipelined writeback of this
        # tile overlaps the next grid step's row DMAs.
        out_ref[...] = buf_ref[...]

    return kernel


def combine_embedding_lookup(packed_table, vocab_sizes, dims, dtypes, indices,
                             block_n=DEFAULT_BLOCK_N):
    """Fused gather: returns [table_t[indices_t] for all t] via one pallas_call."""
    num_tables = len(vocab_sizes)
    assert len(indices) == num_tables
    vocab_total, d_pad = packed_table.shape
    slab_dtype = packed_table.dtype

    lens = [int(ix.shape[0]) for ix in indices]
    max_len = max(lens)

    # Split the per-table lookup count into evenly sized, 8-aligned tiles so
    # awkward batch sizes don't pad almost a whole extra tile.
    n_tiles = pl.cdiv(max_len, block_n)
    bn = _round_up(pl.cdiv(max_len, n_tiles), 8)
    n_pad = n_tiles * bn

    # Per-table vocab offsets into the row-packed table.
    vocab_offsets = []
    off = 0
    for v in vocab_sizes:
        vocab_offsets.append(off)
        off += v

    # Flatten all indices into one global row-id vector of length T * n_pad.
    # NOTE: jnp.clip maps out-of-range / negative indices to a valid row
    # (torch.nn.Embedding would raise); pad rows gather row 0 of their table
    # and are sliced off below.
    cols = []
    for t, ix in enumerate(indices):
        ix = jnp.clip(ix.astype(jnp.int32), 0, vocab_sizes[t] - 1) + vocab_offsets[t]
        if ix.shape[0] < n_pad:
            ix = jnp.pad(ix, (0, n_pad - ix.shape[0]),
                         constant_values=vocab_offsets[t])
        cols.append(ix)
    global_idx = jnp.concatenate(cols, axis=0)          # (T * n_pad,) int32

    total_rows = num_tables * n_pad
    grid = total_rows // bn                              # >= num_tables (>=2 tiles for >=2 tables)

    kernel = _make_gather_kernel(bn)

    itemsize = jnp.dtype(slab_dtype).itemsize
    cost = pl.CostEstimate(
        flops=0,
        transcendentals=0,
        bytes_accessed=int(2 * total_rows * d_pad * itemsize + total_rows * 4),
    )

    slab = pl.pallas_call(
        kernel,
        out_shape=jax.ShapeDtypeStruct((total_rows, d_pad), slab_dtype),
        grid_spec=pltpu.PrefetchScalarGridSpec(
            num_scalar_prefetch=1,                       # global_idx -> SMEM
            grid=(grid,),
            in_specs=[
                pl.BlockSpec(memory_space=pl.ANY),       # tables stay in HBM
            ],
            out_specs=pl.BlockSpec((bn, d_pad), lambda i, gidx: (i, 0)),
            scratch_shapes=[
                pltpu.VMEM((bn, d_pad), slab_dtype),     # DMA staging buffer
                pltpu.SemaphoreType.DMA((bn,)),
            ],
        ),
        compiler_params=pltpu.CompilerParams(
            dimension_semantics=("parallel",)),          # disjoint tiles -> v7x 2-TC shard
        cost_estimate=cost,
    )(global_idx, packed_table)

    # Slice the lane-dense slab back into per-table outputs.
    outs = []
    for t in range(num_tables):
        o = slab[t * n_pad: t * n_pad + lens[t], :dims[t]]
        outs.append(o.astype(dtypes[t]))
    return outs


class CombineEmbedding:
    """JAX/Pallas equivalent of kraken.pytorch.CombineEmbedding (forward only).

    kraken batches the parameter-server "pull" across all table ids; here all
    per-table gathers are fused into a single Pallas kernel that DMA-gathers
    the requested rows from one HBM-resident row-packed table into a
    lane-dense output slab, which is then sliced per table.
    """

    def __init__(self, dimensions, dtypes=None, vocab_sizes=None, names=None, seed=0):
        n = len(dimensions)
        if dtypes is None:
            dtypes = [jnp.float32] * n
        if vocab_sizes is None:
            vocab_sizes = [64] * n
        assert len(dtypes) == n and len(vocab_sizes) == n
        self.dimensions = list(dimensions)
        self.vocab_sizes = list(vocab_sizes)
        self.dtypes = list(dtypes)
        self.names = names or [f"table_{i}" for i in range(n)]

        # Deterministic in-script initialization (stand-in for kraken Initializer).
        keys = jax.random.split(jax.random.PRNGKey(seed), n)
        self.tables = [
            (jax.random.normal(k, (v, d), dtype=jnp.float32) * 0.01).astype(dt)
            for k, v, d, dt in zip(keys, vocab_sizes, dimensions, dtypes)
        ]

        # Row-wise packing: table t -> rows [v_off_t, v_off_t + V_t), cols [0, D_t).
        # Embedding axis padded to 128 lanes; slab dtype = promoted table dtype
        # (exact for bf16 tables promoted to f32 and cast back).
        self.d_pad = _round_up(max(self.dimensions), LANES)
        self.vocab_total = sum(self.vocab_sizes)
        self.slab_dtype = jnp.result_type(*self.dtypes)
        packed = jnp.zeros((self.vocab_total, self.d_pad), self.slab_dtype)
        v_off = 0
        for tbl, v, d in zip(self.tables, self.vocab_sizes, self.dimensions):
            packed = packed.at[v_off:v_off + v, :d].set(tbl.astype(self.slab_dtype))
            v_off += v
        self.packed_table = packed

    def table_ids(self):
        return list(range(len(self.tables)))

    def __call__(self, indices):
        assert len(self.table_ids()) == len(indices)
        # TODO(synk): backward (combine_push_sparse_table gradient scatter) not implemented.
        return combine_embedding_lookup(
            self.packed_table, self.vocab_sizes, self.dimensions, self.dtypes,
            indices)


if __name__ == "__main__":
    # Small synthetic setup: 3 sparse tables with dims 8 / 16 / 32, vocab 64,
    # 16 lookups per table.
    dimensions = [8, 16, 32]
    vocab_sizes = [64, 64, 64]
    num_indices = 16

    model = CombineEmbedding(dimensions, vocab_sizes=vocab_sizes, seed=0)

    key = jax.random.PRNGKey(0)
    idx_keys = jax.random.split(key, len(dimensions))
    indices = [
        jax.random.randint(k, (num_indices,), 0, v, dtype=jnp.int32)
        for k, v in zip(idx_keys, vocab_sizes)
    ]

    outs = model(indices)
    outs = [jax.block_until_ready(o) for o in outs]

    # Reference check (plain JAX gather).
    for o, t, idx in zip(outs, model.tables, indices):
        ref = jnp.take(t, idx, axis=0)
        assert o.shape == ref.shape and o.dtype == ref.dtype
        assert jnp.allclose(o, ref, rtol=1e-5, atol=1e-6), "mismatch vs reference gather"

    print("KERNEL_OK")
</pallas_src>

<mosaic_0001>
module attributes {stable_mosaic.version = 11 : i64} {
  func.func @kernel(%arg0: i32, %arg1: memref<48xi32, #tpu.memory_space<smem>>, %arg2: memref<192x128xf32, #tpu.memory_space<any>>, %arg3: memref<16x128xf32, #tpu.memory_space<vmem>>, %arg4: memref<16x128xf32, #tpu.memory_space<vmem>>, %arg5: memref<16x!tpu.dma_semaphore, #tpu.memory_space<semaphore_mem>>) attributes {dimension_semantics = [#tpu.dimension_semantics<parallel>], iteration_bounds = array<i64: 3>, scalar_prefetch = 1 : i64, scratch_operands = 2 : i64, tpu.core_type = #tpu.core_type<tc>, window_params = [{}, {transform_indices = @transform_1, window_bounds = array<i64: 16, 128>}]} {
    %c16_i32 = arith.constant 16 : i32
    %0 = arith.muli %arg0, %c16_i32 : i32
    %c0_i32 = arith.constant 0 : i32
    %1 = arith.addi %0, %c0_i32 : i32
    %2 = arith.index_cast %1 : i32 to index
    %3 = memref.load %arg1[%2] : memref<48xi32, #tpu.memory_space<smem>>
    %c0_i32_0 = arith.constant 0 : i32
    %c0_i32_1 = arith.constant 0 : i32
    %4 = tpu.memref_slice %arg2[%3, %c0_i32_1] : memref<192x128xf32, #tpu.memory_space<any>> -> memref<1x128xf32, #tpu.memory_space<any>>
    %c0_i32_2 = arith.constant 0 : i32
    %c0_i32_3 = arith.constant 0 : i32
    %5 = tpu.memref_slice %arg4[%c0_i32_2, %c0_i32_3] : memref<16x128xf32, #tpu.memory_space<vmem>> -> memref<1x128xf32, #tpu.memory_space<vmem>>
    %6 = tpu.memref_slice %arg5[%c0_i32_0] : memref<16x!tpu.dma_semaphore, #tpu.memory_space<semaphore_mem>> -> memref<1x!tpu.dma_semaphore, #tpu.memory_space<semaphore_mem>>
    %7 = tpu.memref_squeeze %6 : memref<1x!tpu.dma_semaphore, #tpu.memory_space<semaphore_mem>> -> memref<!tpu.dma_semaphore, #tpu.memory_space<semaphore_mem>>
    tpu.enqueue_dma source(%4 : memref<1x128xf32, #tpu.memory_space<any>>) target(%5 : memref<1x128xf32, #tpu.memory_space<vmem>>) target_semaphore(%7 : memref<!tpu.dma_semaphore, #tpu.memory_space<semaphore_mem>>)
    %c1_i32 = arith.constant 1 : i32
    %8 = arith.addi %0, %c1_i32 : i32
    %9 = arith.index_cast %8 : i32 to index
    %10 = memref.load %arg1[%9] : memref<48xi32, #tpu.memory_space<smem>>
    %c1_i32_4 = arith.constant 1 : i32
    %c0_i32_5 = arith.constant 0 : i32
    %11 = tpu.memref_slice %arg2[%10, %c0_i32_5] : memref<192x128xf32, #tpu.memory_space<any>> -> memref<1x128xf32, #tpu.memory_space<any>>
    %c1_i32_6 = arith.constant 1 : i32
    %c0_i32_7 = arith.constant 0 : i32
    %12 = tpu.memref_slice %arg4[%c1_i32_6, %c0_i32_7] : memref<16x128xf32, #tpu.memory_space<vmem>> -> memref<1x128xf32, #tpu.memory_space<vmem>>
    %13 = tpu.memref_slice %arg5[%c1_i32_4] : memref<16x!tpu.dma_semaphore, #tpu.memory_space<semaphore_mem>> -> memref<1x!tpu.dma_semaphore, #tpu.memory_space<semaphore_mem>>
    %14 = tpu.memref_squeeze %13 : memref<1x!tpu.dma_semaphore, #tpu.memory_space<semaphore_mem>> -> memref<!tpu.dma_semaphore, #tpu.memory_space<semaphore_mem>>
    tpu.enqueue_dma source(%11 : memref<1x128xf32, #tpu.memory_space<any>>) target(%12 : memref<1x128xf32, #tpu.memory_space<vmem>>) target_semaphore(%14 : memref<!tpu.dma_semaphore, #tpu.memory_space<semaphore_mem>>)
    %c2_i32 = arith.constant 2 : i32
    %15 = arith.addi %0, %c2_i32 : i32
    %16 = arith.index_cast %15 : i32 to index
    %17 = memref.load %arg1[%16] : memref<48xi32, #tpu.memory_space<smem>>
    %c2_i32_8 = arith.constant 2 : i32
    %c0_i32_9 = arith.constant 0 : i32
    %18 = tpu.memref_slice %arg2[%17, %c0_i32_9] : memref<192x128xf32, #tpu.memory_space<any>> -> memref<1x128xf32, #tpu.memory_space<any>>
    %c2_i32_10 = arith.constant 2 : i32
    %c0_i32_11 = arith.constant 0 : i32
    %19 = tpu.memref_slice %arg4[%c2_i32_10, %c0_i32_11] : memref<16x128xf32, #tpu.memory_space<vmem>> -> memref<1x128xf32, #tpu.memory_space<vmem>>
    %20 = tpu.memref_slice %arg5[%c2_i32_8] : memref<16x!tpu.dma_semaphore, #tpu.memory_space<semaphore_mem>> -> memref<1x!tpu.dma_semaphore, #tpu.memory_space<semaphore_mem>>
    %21 = tpu.memref_squeeze %20 : memref<1x!tpu.dma_semaphore, #tpu.memory_space<semaphore_mem>> -> memref<!tpu.dma_semaphore, #tpu.memory_space<semaphore_mem>>
    tpu.enqueue_dma source(%18 : memref<1x128xf32, #tpu.memory_space<any>>) target(%19 : memref<1x128xf32, #tpu.memory_space<vmem>>) target_semaphore(%21 : memref<!tpu.dma_semaphore, #tpu.memory_space<semaphore_mem>>)
    %c3_i32 = arith.constant 3 : i32
    %22 = arith.addi %0, %c3_i32 : i32
    %23 = arith.index_cast %22 : i32 to index
    %24 = memref.load %arg1[%23] : memref<48xi32, #tpu.memory_space<smem>>
    %c3_i32_12 = arith.constant 3 : i32
    %c0_i32_13 = arith.constant 0 : i32
    %25 = tpu.memref_slice %arg2[%24, %c0_i32_13] : memref<192x128xf32, #tpu.memory_space<any>> -> memref<1x128xf32, #tpu.memory_space<any>>
    %c3_i32_14 = arith.constant 3 : i32
    %c0_i32_15 = arith.constant 0 : i32
    %26 = tpu.memref_slice %arg4[%c3_i32_14, %c0_i32_15] : memref<16x128xf32, #tpu.memory_space<vmem>> -> memref<1x128xf32, #tpu.memory_space<vmem>>
    %27 = tpu.memref_slice %arg5[%c3_i32_12] : memref<16x!tpu.dma_semaphore, #tpu.memory_space<semaphore_mem>> -> memref<1x!tpu.dma_semaphore, #tpu.memory_space<semaphore_mem>>
    %28 = tpu.memref_squeeze %27 : memref<1x!tpu.dma_semaphore, #tpu.memory_space<semaphore_mem>> -> memref<!tpu.dma_semaphore, #tpu.memory_space<semaphore_mem>>
    tpu.enqueue_dma source(%25 : memref<1x128xf32, #tpu.memory_space<any>>) target(%26 : memref<1x128xf32, #tpu.memory_space<vmem>>) target_semaphore(%28 : memref<!tpu.dma_semaphore, #tpu.memory_space<semaphore_mem>>)
    %c4_i32 = arith.constant 4 : i32
    %29 = arith.addi %0, %c4_i32 : i32
    %30 = arith.index_cast %29 : i32 to index
    %31 = memref.load %arg1[%30] : memref<48xi32, #tpu.memory_space<smem>>
    %c4_i32_16 = arith.constant 4 : i32
    %c0_i32_17 = arith.constant 0 : i32
    %32 = tpu.memref_slice %arg2[%31, %c0_i32_17] : memref<192x128xf32, #tpu.memory_space<any>> -> memref<1x128xf32, #tpu.memory_space<any>>
    %c4_i32_18 = arith.constant 4 : i32
    %c0_i32_19 = arith.constant 0 : i32
    %33 = tpu.memref_slice %arg4[%c4_i32_18, %c0_i32_19] : memref<16x128xf32, #tpu.memory_space<vmem>> -> memref<1x128xf32, #tpu.memory_space<vmem>>
    %34 = tpu.memref_slice %arg5[%c4_i32_16] : memref<16x!tpu.dma_semaphore, #tpu.memory_space<semaphore_mem>> -> memref<1x!tpu.dma_semaphore, #tpu.memory_space<semaphore_mem>>
    %35 = tpu.memref_squeeze %34 : memref<1x!tpu.dma_semaphore, #tpu.memory_space<semaphore_mem>> -> memref<!tpu.dma_semaphore, #tpu.memory_space<semaphore_mem>>
    tpu.enqueue_dma source(%32 : memref<1x128xf32, #tpu.memory_space<any>>) target(%33 : memref<1x128xf32, #tpu.memory_space<vmem>>) target_semaphore(%35 : memref<!tpu.dma_semaphore, #tpu.memory_space<semaphore_mem>>)
    %c5_i32 = arith.constant 5 : i32
    %36 = arith.addi %0, %c5_i32 : i32
    %37 = arith.index_cast %36 : i32 to index
    %38 = memref.load %arg1[%37] : memref<48xi32, #tpu.memory_space<smem>>
    %c5_i32_20 = arith.constant 5 : i32
    %c0_i32_21 = arith.constant 0 : i32
    %39 = tpu.memref_slice %arg2[%38, %c0_i32_21] : memref<192x128xf32, #tpu.memory_space<any>> -> memref<1x128xf32, #tpu.memory_space<any>>
    %c5_i32_22 = arith.constant 5 : i32
    %c0_i32_23 = arith.constant 0 : i32
    %40 = tpu.memref_slice %arg4[%c5_i32_22, %c0_i32_23] : memref<16x128xf32, #tpu.memory_space<vmem>> -> memref<1x128xf32, #tpu.memory_space<vmem>>
    %41 = tpu.memref_slice %arg5[%c5_i32_20] : memref<16x!tpu.dma_semaphore, #tpu.memory_space<semaphore_mem>> -> memref<1x!tpu.dma_semaphore, #tpu.memory_space<semaphore_mem>>
    %42 = tpu.memref_squeeze %41 : memref<1x!tpu.dma_semaphore, #tpu.memory_space<semaphore_mem>> -> memref<!tpu.dma_semaphore, #tpu.memory_space<semaphore_mem>>
    tpu.enqueue_dma source(%39 : memref<1x128xf32, #tpu.memory_space<any>>) target(%40 : memref<1x128xf32, #tpu.memory_space<vmem>>) target_semaphore(%42 : memref<!tpu.dma_semaphore, #tpu.memory_space<semaphore_mem>>)
    %c6_i32 = arith.constant 6 : i32
    %43 = arith.addi %0, %c6_i32 : i32
    %44 = arith.index_cast %43 : i32 to index
    %45 = memref.load %arg1[%44] : memref<48xi32, #tpu.memory_space<smem>>
    %c6_i32_24 = arith.constant 6 : i32
    %c0_i32_25 = arith.constant 0 : i32
    %46 = tpu.memref_slice %arg2[%45, %c0_i32_25] : memref<192x128xf32, #tpu.memory_space<any>> -> memref<1x128xf32, #tpu.memory_space<any>>
    %c6_i32_26 = arith.constant 6 : i32
    %c0_i32_27 = arith.constant 0 : i32
    %47 = tpu.memref_slice %arg4[%c6_i32_26, %c0_i32_27] : memref<16x128xf32, #tpu.memory_space<vmem>> -> memref<1x128xf32, #tpu.memory_space<vmem>>
    %48 = tpu.memref_slice %arg5[%c6_i32_24] : memref<16x!tpu.dma_semaphore, #tpu.memory_space<semaphore_mem>> -> memref<1x!tpu.dma_semaphore, #tpu.memory_space<semaphore_mem>>
    %49 = tpu.memref_squeeze %48 : memref<1x!tpu.dma_semaphore, #tpu.memory_space<semaphore_mem>> -> memref<!tpu.dma_semaphore, #tpu.memory_space<semaphore_mem>>
    tpu.enqueue_dma source(%46 : memref<1x128xf32, #tpu.memory_space<any>>) target(%47 : memref<1x128xf32, #tpu.memory_space<vmem>>) target_semaphore(%49 : memref<!tpu.dma_semaphore, #tpu.memory_space<semaphore_mem>>)
    %c7_i32 = arith.constant 7 : i32
    %50 = arith.addi %0, %c7_i32 : i32
    %51 = arith.index_cast %50 : i32 to index
    %52 = memref.load %arg1[%51] : memref<48xi32, #tpu.memory_space<smem>>
    %c7_i32_28 = arith.constant 7 : i32
    %c0_i32_29 = arith.constant 0 : i32
    %53 = tpu.memref_slice %arg2[%52, %c0_i32_29] : memref<192x128xf32, #tpu.memory_space<any>> -> memref<1x128xf32, #tpu.memory_space<any>>
    %c7_i32_30 = arith.constant 7 : i32
    %c0_i32_31 = arith.constant 0 : i32
    %54 = tpu.memref_slice %arg4[%c7_i32_30, %c0_i32_31] : memref<16x128xf32, #tpu.memory_space<vmem>> -> memref<1x128xf32, #tpu.memory_space<vmem>>
    %55 = tpu.memref_slice %arg5[%c7_i32_28] : memref<16x!tpu.dma_semaphore, #tpu.memory_space<semaphore_mem>> -> memref<1x!tpu.dma_semaphore, #tpu.memory_space<semaphore_mem>>
    %56 = tpu.memref_squeeze %55 : memref<1x!tpu.dma_semaphore, #tpu.memory_space<semaphore_mem>> -> memref<!tpu.dma_semaphore, #tpu.memory_space<semaphore_mem>>
    tpu.enqueue_dma source(%53 : memref<1x128xf32, #tpu.memory_space<any>>) target(%54 : memref<1x128xf32, #tpu.memory_space<vmem>>) target_semaphore(%56 : memref<!tpu.dma_semaphore, #tpu.memory_space<semaphore_mem>>)
    %c8_i32 = arith.constant 8 : i32
    %57 = arith.addi %0, %c8_i32 : i32
    %58 = arith.index_cast %57 : i32 to index
    %59 = memref.load %arg1[%58] : memref<48xi32, #tpu.memory_space<smem>>
    %c8_i32_32 = arith.constant 8 : i32
    %c0_i32_33 = arith.constant 0 : i32
    %60 = tpu.memref_slice %arg2[%59, %c0_i32_33] : memref<192x128xf32, #tpu.memory_space<any>> -> memref<1x128xf32, #tpu.memory_space<any>>
    %c8_i32_34 = arith.constant 8 : i32
    %c0_i32_35 = arith.constant 0 : i32
    %61 = tpu.memref_slice %arg4[%c8_i32_34, %c0_i32_35] : memref<16x128xf32, #tpu.memory_space<vmem>> -> memref<1x128xf32, #tpu.memory_space<vmem>>
    %62 = tpu.memref_slice %arg5[%c8_i32_32] : memref<16x!tpu.dma_semaphore, #tpu.memory_space<semaphore_mem>> -> memref<1x!tpu.dma_semaphore, #tpu.memory_space<semaphore_mem>>
    %63 = tpu.memref_squeeze %62 : memref<1x!tpu.dma_semaphore, #tpu.memory_space<semaphore_mem>> -> memref<!tpu.dma_semaphore, #tpu.memory_space<semaphore_mem>>
    tpu.enqueue_dma source(%60 : memref<1x128xf32, #tpu.memory_space<any>>) target(%61 : memref<1x128xf32, #tpu.memory_space<vmem>>) target_semaphore(%63 : memref<!tpu.dma_semaphore, #tpu.memory_space<semaphore_mem>>)
    %c9_i32 = arith.constant 9 : i32
    %64 = arith.addi %0, %c9_i32 : i32
    %65 = arith.index_cast %64 : i32 to index
    %66 = memref.load %arg1[%65] : memref<48xi32, #tpu.memory_space<smem>>
    %c9_i32_36 = arith.constant 9 : i32
    %c0_i32_37 = arith.constant 0 : i32
    %67 = tpu.memref_slice %arg2[%66, %c0_i32_37] : memref<192x128xf32, #tpu.memory_space<any>> -> memref<1x128xf32, #tpu.memory_space<any>>
    %c9_i32_38 = arith.constant 9 : i32
    %c0_i32_39 = arith.constant 0 : i32
    %68 = tpu.memref_slice %arg4[%c9_i32_38, %c0_i32_39] : memref<16x128xf32, #tpu.memory_space<vmem>> -> memref<1x128xf32, #tpu.memory_space<vmem>>
    %69 = tpu.memref_slice %arg5[%c9_i32_36] : memref<16x!tpu.dma_semaphore, #tpu.memory_space<semaphore_mem>> -> memref<1x!tpu.dma_semaphore, #tpu.memory_space<semaphore_mem>>
    %70 = tpu.memref_squeeze %69 : memref<1x!tpu.dma_semaphore, #tpu.memory_space<semaphore_mem>> -> memref<!tpu.dma_semaphore, #tpu.memory_space<semaphore_mem>>
    tpu.enqueue_dma source(%67 : memref<1x128xf32, #tpu.memory_space<any>>) target(%68 : memref<1x128xf32, #tpu.memory_space<vmem>>) target_semaphore(%70 : memref<!tpu.dma_semaphore, #tpu.memory_space<semaphore_mem>>)
    %c10_i32 = arith.constant 10 : i32
    %71 = arith.addi %0, %c10_i32 : i32
    %72 = arith.index_cast %71 : i32 to index
    %73 = memref.load %arg1[%72] : memref<48xi32, #tpu.memory_space<smem>>
    %c10_i32_40 = arith.constant 10 : i32
    %c0_i32_41 = arith.constant 0 : i32
    %74 = tpu.memref_slice %arg2[%73, %c0_i32_41] : memref<192x128xf32, #tpu.memory_space<any>> -> memref<1x128xf32, #tpu.memory_space<any>>
    %c10_i32_42 = arith.constant 10 : i32
    %c0_i32_43 = arith.constant 0 : i32
    %75 = tpu.memref_slice %arg4[%c10_i32_42, %c0_i32_43] : memref<16x128xf32, #tpu.memory_space<vmem>> -> memref<1x128xf32, #tpu.memory_space<vmem>>
    %76 = tpu.memref_slice %arg5[%c10_i32_40] : memref<16x!tpu.dma_semaphore, #tpu.memory_space<semaphore_mem>> -> memref<1x!tpu.dma_semaphore, #tpu.memory_space<semaphore_mem>>
    %77 = tpu.memref_squeeze %76 : memref<1x!tpu.dma_semaphore, #tpu.memory_space<semaphore_mem>> -> memref<!tpu.dma_semaphore, #tpu.memory_space<semaphore_mem>>
    tpu.enqueue_dma source(%74 : memref<1x128xf32, #tpu.memory_space<any>>) target(%75 : memref<1x128xf32, #tpu.memory_space<vmem>>) target_semaphore(%77 : memref<!tpu.dma_semaphore, #tpu.memory_space<semaphore_mem>>)
    %c11_i32 = arith.constant 11 : i32
    %78 = arith.addi %0, %c11_i32 : i32
    %79 = arith.index_cast %78 : i32 to index
    %80 = memref.load %arg1[%79] : memref<48xi32, #tpu.memory_space<smem>>
    %c11_i32_44 = arith.constant 11 : i32
    %c0_i32_45 = arith.constant 0 : i32
    %81 = tpu.memref_slice %arg2[%80, %c0_i32_45] : memref<192x128xf32, #tpu.memory_space<any>> -> memref<1x128xf32, #tpu.memory_space<any>>
    %c11_i32_46 = arith.constant 11 : i32
    %c0_i32_47 = arith.constant 0 : i32
    %82 = tpu.memref_slice %arg4[%c11_i32_46, %c0_i32_47] : memref<16x128xf32, #tpu.memory_space<vmem>> -> memref<1x128xf32, #tpu.memory_space<vmem>>
    %83 = tpu.memref_slice %arg5[%c11_i32_44] : memref<16x!tpu.dma_semaphore, #tpu.memory_space<semaphore_mem>> -> memref<1x!tpu.dma_semaphore, #tpu.memory_space<semaphore_mem>>
    %84 = tpu.memref_squeeze %83 : memref<1x!tpu.dma_semaphore, #tpu.memory_space<semaphore_mem>> -> memref<!tpu.dma_semaphore, #tpu.memory_space<semaphore_mem>>
    tpu.enqueue_dma source(%81 : memref<1x128xf32, #tpu.memory_space<any>>) target(%82 : memref<1x128xf32, #tpu.memory_space<vmem>>) target_semaphore(%84 : memref<!tpu.dma_semaphore, #tpu.memory_space<semaphore_mem>>)
    %c12_i32 = arith.constant 12 : i32
    %85 = arith.addi %0, %c12_i32 : i32
    %86 = arith.index_cast %85 : i32 to index
    %87 = memref.load %arg1[%86] : memref<48xi32, #tpu.memory_space<smem>>
    %c12_i32_48 = arith.constant 12 : i32
    %c0_i32_49 = arith.constant 0 : i32
    %88 = tpu.memref_slice %arg2[%87, %c0_i32_49] : memref<192x128xf32, #tpu.memory_space<any>> -> memref<1x128xf32, #tpu.memory_space<any>>
    %c12_i32_50 = arith.constant 12 : i32
    %c0_i32_51 = arith.constant 0 : i32
    %89 = tpu.memref_slice %arg4[%c12_i32_50, %c0_i32_51] : memref<16x128xf32, #tpu.memory_space<vmem>> -> memref<1x128xf32, #tpu.memory_space<vmem>>
    %90 = tpu.memref_slice %arg5[%c12_i32_48] : memref<16x!tpu.dma_semaphore, #tpu.memory_space<semaphore_mem>> -> memref<1x!tpu.dma_semaphore, #tpu.memory_space<semaphore_mem>>
    %91 = tpu.memref_squeeze %90 : memref<1x!tpu.dma_semaphore, #tpu.memory_space<semaphore_mem>> -> memref<!tpu.dma_semaphore, #tpu.memory_space<semaphore_mem>>
    tpu.enqueue_dma source(%88 : memref<1x128xf32, #tpu.memory_space<any>>) target(%89 : memref<1x128xf32, #tpu.memory_space<vmem>>) target_semaphore(%91 : memref<!tpu.dma_semaphore, #tpu.memory_space<semaphore_mem>>)
    %c13_i32 = arith.constant 13 : i32
    %92 = arith.addi %0, %c13_i32 : i32
    %93 = arith.index_cast %92 : i32 to index
    %94 = memref.load %arg1[%93] : memref<48xi32, #tpu.memory_space<smem>>
    %c13_i32_52 = arith.constant 13 : i32
    %c0_i32_53 = arith.constant 0 : i32
    %95 = tpu.memref_slice %arg2[%94, %c0_i32_53] : memref<192x128xf32, #tpu.memory_space<any>> -> memref<1x128xf32, #tpu.memory_space<any>>
    %c13_i32_54 = arith.constant 13 : i32
    %c0_i32_55 = arith.constant 0 : i32
    %96 = tpu.memref_slice %arg4[%c13_i32_54, %c0_i32_55] : memref<16x128xf32, #tpu.memory_space<vmem>> -> memref<1x128xf32, #tpu.memory_space<vmem>>
    %97 = tpu.memref_slice %arg5[%c13_i32_52] : memref<16x!tpu.dma_semaphore, #tpu.memory_space<semaphore_mem>> -> memref<1x!tpu.dma_semaphore, #tpu.memory_space<semaphore_mem>>
    %98 = tpu.memref_squeeze %97 : memref<1x!tpu.dma_semaphore, #tpu.memory_space<semaphore_mem>> -> memref<!tpu.dma_semaphore, #tpu.memory_space<semaphore_mem>>
    tpu.enqueue_dma source(%95 : memref<1x128xf32, #tpu.memory_space<any>>) target(%96 : memref<1x128xf32, #tpu.memory_space<vmem>>) target_semaphore(%98 : memref<!tpu.dma_semaphore, #tpu.memory_space<semaphore_mem>>)
    %c14_i32 = arith.constant 14 : i32
    %99 = arith.addi %0, %c14_i32 : i32
    %100 = arith.index_cast %99 : i32 to index
    %101 = memref.load %arg1[%100] : memref<48xi32, #tpu.memory_space<smem>>
    %c14_i32_56 = arith.constant 14 : i32
    %c0_i32_57 = arith.constant 0 : i32
    %102 = tpu.memref_slice %arg2[%101, %c0_i32_57] : memref<192x128xf32, #tpu.memory_space<any>> -> memref<1x128xf32, #tpu.memory_space<any>>
    %c14_i32_58 = arith.constant 14 : i32
    %c0_i32_59 = arith.constant 0 : i32
    %103 = tpu.memref_slice %arg4[%c14_i32_58, %c0_i32_59] : memref<16x128xf32, #tpu.memory_space<vmem>> -> memref<1x128xf32, #tpu.memory_space<vmem>>
    %104 = tpu.memref_slice %arg5[%c14_i32_56] : memref<16x!tpu.dma_semaphore, #tpu.memory_space<semaphore_mem>> -> memref<1x!tpu.dma_semaphore, #tpu.memory_space<semaphore_mem>>
    %105 = tpu.memref_squeeze %104 : memref<1x!tpu.dma_semaphore, #tpu.memory_space<semaphore_mem>> -> memref<!tpu.dma_semaphore, #tpu.memory_space<semaphore_mem>>
    tpu.enqueue_dma source(%102 : memref<1x128xf32, #tpu.memory_space<any>>) target(%103 : memref<1x128xf32, #tpu.memory_space<vmem>>) target_semaphore(%105 : memref<!tpu.dma_semaphore, #tpu.memory_space<semaphore_mem>>)
    %c15_i32 = arith.constant 15 : i32
    %106 = arith.addi %0, %c15_i32 : i32
    %107 = arith.index_cast %106 : i32 to index
    %108 = memref.load %arg1[%107] : memref<48xi32, #tpu.memory_space<smem>>
    %c15_i32_60 = arith.constant 15 : i32
    %c0_i32_61 = arith.constant 0 : i32
    %109 = tpu.memref_slice %arg2[%108, %c0_i32_61] : memref<192x128xf32, #tpu.memory_space<any>> -> memref<1x128xf32, #tpu.memory_space<any>>
    %c15_i32_62 = arith.constant 15 : i32
    %c0_i32_63 = arith.constant 0 : i32
    %110 = tpu.memref_slice %arg4[%c15_i32_62, %c0_i32_63] : memref<16x128xf32, #tpu.memory_space<vmem>> -> memref<1x128xf32, #tpu.memory_space<vmem>>
    %111 = tpu.memref_slice %arg5[%c15_i32_60] : memref<16x!tpu.dma_semaphore, #tpu.memory_space<semaphore_mem>> -> memref<1x!tpu.dma_semaphore, #tpu.memory_space<semaphore_mem>>
    %112 = tpu.memref_squeeze %111 : memref<1x!tpu.dma_semaphore, #tpu.memory_space<semaphore_mem>> -> memref<!tpu.dma_semaphore, #tpu.memory_space<semaphore_mem>>
    tpu.enqueue_dma source(%109 : memref<1x128xf32, #tpu.memory_space<any>>) target(%110 : memref<1x128xf32, #tpu.memory_space<vmem>>) target_semaphore(%112 : memref<!tpu.dma_semaphore, #tpu.memory_space<semaphore_mem>>)
    %c0_i32_64 = arith.constant 0 : i32
    %c0_i32_65 = arith.constant 0 : i32
    %113 = tpu.memref_slice %arg2[%3, %c0_i32_65] : memref<192x128xf32, #tpu.memory_space<any>> -> memref<1x128xf32, #tpu.memory_space<any>>
    %c0_i32_66 = arith.constant 0 : i32
    %c0_i32_67 = arith.constant 0 : i32
    %114 = tpu.memref_slice %arg4[%c0_i32_66, %c0_i32_67] : memref<16x128xf32, #tpu.memory_space<vmem>> -> memref<1x128xf32, #tpu.memory_space<vmem>>
    %115 = tpu.memref_slice %arg5[%c0_i32_64] : memref<16x!tpu.dma_semaphore, #tpu.memory_space<semaphore_mem>> -> memref<1x!tpu.dma_semaphore, #tpu.memory_space<semaphore_mem>>
    %116 = tpu.memref_squeeze %115 : memref<1x!tpu.dma_semaphore, #tpu.memory_space<semaphore_mem>> -> memref<!tpu.dma_semaphore, #tpu.memory_space<semaphore_mem>>
    tpu.wait_dma2 semaphore(%116 : memref<!tpu.dma_semaphore, #tpu.memory_space<semaphore_mem>>) src(%113 : memref<1x128xf32, #tpu.memory_space<any>>) dst(%114 : memref<1x128xf32, #tpu.memory_space<vmem>>)
    %c1_i32_68 = arith.constant 1 : i32
    %c0_i32_69 = arith.constant 0 : i32
    %117 = tpu.memref_slice %arg2[%10, %c0_i32_69] : memref<192x128xf32, #tpu.memory_space<any>> -> memref<1x128xf32, #tpu.memory_space<any>>
    %c1_i32_70 = arith.constant 1 : i32
    %c0_i32_71 = arith.constant 0 : i32
    %118 = tpu.memref_slice %arg4[%c1_i32_70, %c0_i32_71] : memref<16x128xf32, #tpu.memory_space<vmem>> -> memref<1x128xf32, #tpu.memory_space<vmem>>
    %119 = tpu.memref_slice %arg5[%c1_i32_68] : memref<16x!tpu.dma_semaphore, #tpu.memory_space<semaphore_mem>> -> memref<1x!tpu.dma_semaphore, #tpu.memory_space<semaphore_mem>>
    %120 = tpu.memref_squeeze %119 : memref<1x!tpu.dma_semaphore, #tpu.memory_space<semaphore_mem>> -> memref<!tpu.dma_semaphore, #tpu.memory_space<semaphore_mem>>
    tpu.wait_dma2 semaphore(%120 : memref<!tpu.dma_semaphore, #tpu.memory_space<semaphore_mem>>) src(%117 : memref<1x128xf32, #tpu.memory_space<any>>) dst(%118 : memref<1x128xf32, #tpu.memory_space<vmem>>)
    %c2_i32_72 = arith.constant 2 : i32
    %c0_i32_73 = arith.constant 0 : i32
    %121 = tpu.memref_slice %arg2[%17, %c0_i32_73] : memref<192x128xf32, #tpu.memory_space<any>> -> memref<1x128xf32, #tpu.memory_space<any>>
    %c2_i32_74 = arith.constant 2 : i32
    %c0_i32_75 = arith.constant 0 : i32
    %122 = tpu.memref_slice %arg4[%c2_i32_74, %c0_i32_75] : memref<16x128xf32, #tpu.memory_space<vmem>> -> memref<1x128xf32, #tpu.memory_space<vmem>>
    %123 = tpu.memref_slice %arg5[%c2_i32_72] : memref<16x!tpu.dma_semaphore, #tpu.memory_space<semaphore_mem>> -> memref<1x!tpu.dma_semaphore, #tpu.memory_space<semaphore_mem>>
    %124 = tpu.memref_squeeze %123 : memref<1x!tpu.dma_semaphore, #tpu.memory_space<semaphore_mem>> -> memref<!tpu.dma_semaphore, #tpu.memory_space<semaphore_mem>>
    tpu.wait_dma2 semaphore(%124 : memref<!tpu.dma_semaphore, #tpu.memory_space<semaphore_mem>>) src(%121 : memref<1x128xf32, #tpu.memory_space<any>>) dst(%122 : memref<1x128xf32, #tpu.memory_space<vmem>>)
    %c3_i32_76 = arith.constant 3 : i32
    %c0_i32_77 = arith.constant 0 : i32
    %125 = tpu.memref_slice %arg2[%24, %c0_i32_77] : memref<192x128xf32, #tpu.memory_space<any>> -> memref<1x128xf32, #tpu.memory_space<any>>
    %c3_i32_78 = arith.constant 3 : i32
    %c0_i32_79 = arith.constant 0 : i32
    %126 = tpu.memref_slice %arg4[%c3_i32_78, %c0_i32_79] : memref<16x128xf32, #tpu.memory_space<vmem>> -> memref<1x128xf32, #tpu.memory_space<vmem>>
    %127 = tpu.memref_slice %arg5[%c3_i32_76] : memref<16x!tpu.dma_semaphore, #tpu.memory_space<semaphore_mem>> -> memref<1x!tpu.dma_semaphore, #tpu.memory_space<semaphore_mem>>
    %128 = tpu.memref_squeeze %127 : memref<1x!tpu.dma_semaphore, #tpu.memory_space<semaphore_mem>> -> memref<!tpu.dma_semaphore, #tpu.memory_space<semaphore_mem>>
    tpu.wait_dma2 semaphore(%128 : memref<!tpu.dma_semaphore, #tpu.memory_space<semaphore_mem>>) src(%125 : memref<1x128xf32, #tpu.memory_space<any>>) dst(%126 : memref<1x128xf32, #tpu.memory_space<vmem>>)
    %c4_i32_80 = arith.constant 4 : i32
    %c0_i32_81 = arith.constant 0 : i32
    %129 = tpu.memref_slice %arg2[%31, %c0_i32_81] : memref<192x128xf32, #tpu.memory_space<any>> -> memref<1x128xf32, #tpu.memory_space<any>>
    %c4_i32_82 = arith.constant 4 : i32
    %c0_i32_83 = arith.constant 0 : i32
    %130 = tpu.memref_slice %arg4[%c4_i32_82, %c0_i32_83] : memref<16x128xf32, #tpu.memory_space<vmem>> -> memref<1x128xf32, #tpu.memory_space<vmem>>
    %131 = tpu.memref_slice %arg5[%c4_i32_80] : memref<16x!tpu.dma_semaphore, #tpu.memory_space<semaphore_mem>> -> memref<1x!tpu.dma_semaphore, #tpu.memory_space<semaphore_mem>>
    %132 = tpu.memref_squeeze %131 : memref<1x!tpu.dma_semaphore, #tpu.memory_space<semaphore_mem>> -> memref<!tpu.dma_semaphore, #tpu.memory_space<semaphore_mem>>
    tpu.wait_dma2 semaphore(%132 : memref<!tpu.dma_semaphore, #tpu.memory_space<semaphore_mem>>) src(%129 : memref<1x128xf32, #tpu.memory_space<any>>) dst(%130 : memref<1x128xf32, #tpu.memory_space<vmem>>)
    %c5_i32_84 = arith.constant 5 : i32
    %c0_i32_85 = arith.constant 0 : i32
    %133 = tpu.memref_slice %arg2[%38, %c0_i32_85] : memref<192x128xf32, #tpu.memory_space<any>> -> memref<1x128xf32, #tpu.memory_space<any>>
    %c5_i32_86 = arith.constant 5 : i32
    %c0_i32_87 = arith.constant 0 : i32
    %134 = tpu.memref_slice %arg4[%c5_i32_86, %c0_i32_87] : memref<16x128xf32, #tpu.memory_space<vmem>> -> memref<1x128xf32, #tpu.memory_space<vmem>>
    %135 = tpu.memref_slice %arg5[%c5_i32_84] : memref<16x!tpu.dma_semaphore, #tpu.memory_space<semaphore_mem>> -> memref<1x!tpu.dma_semaphore, #tpu.memory_space<semaphore_mem>>
    %136 = tpu.memref_squeeze %135 : memref<1x!tpu.dma_semaphore, #tpu.memory_space<semaphore_mem>> -> memref<!tpu.dma_semaphore, #tpu.memory_space<semaphore_mem>>
    tpu.wait_dma2 semaphore(%136 : memref<!tpu.dma_semaphore, #tpu.memory_space<semaphore_mem>>) src(%133 : memref<1x128xf32, #tpu.memory_space<any>>) dst(%134 : memref<1x128xf32, #tpu.memory_space<vmem>>)
    %c6_i32_88 = arith.constant 6 : i32
    %c0_i32_89 = arith.constant 0 : i32
    %137 = tpu.memref_slice %arg2[%45, %c0_i32_89] : memref<192x128xf32, #tpu.memory_space<any>> -> memref<1x128xf32, #tpu.memory_space<any>>
    %c6_i32_90 = arith.constant 6 : i32
    %c0_i32_91 = arith.constant 0 : i32
    %138 = tpu.memref_slice %arg4[%c6_i32_90, %c0_i32_91] : memref<16x128xf32, #tpu.memory_space<vmem>> -> memref<1x128xf32, #tpu.memory_space<vmem>>
    %139 = tpu.memref_slice %arg5[%c6_i32_88] : memref<16x!tpu.dma_semaphore, #tpu.memory_space<semaphore_mem>> -> memref<1x!tpu.dma_semaphore, #tpu.memory_space<semaphore_mem>>
    %140 = tpu.memref_squeeze %139 : memref<1x!tpu.dma_semaphore, #tpu.memory_space<semaphore_mem>> -> memref<!tpu.dma_semaphore, #tpu.memory_space<semaphore_mem>>
    tpu.wait_dma2 semaphore(%140 : memref<!tpu.dma_semaphore, #tpu.memory_space<semaphore_mem>>) src(%137 : memref<1x128xf32, #tpu.memory_space<any>>) dst(%138 : memref<1x128xf32, #tpu.memory_space<vmem>>)
    %c7_i32_92 = arith.constant 7 : i32
    %c0_i32_93 = arith.constant 0 : i32
    %141 = tpu.memref_slice %arg2[%52, %c0_i32_93] : memref<192x128xf32, #tpu.memory_space<any>> -> memref<1x128xf32, #tpu.memory_space<any>>
    %c7_i32_94 = arith.constant 7 : i32
    %c0_i32_95 = arith.constant 0 : i32
    %142 = tpu.memref_slice %arg4[%c7_i32_94, %c0_i32_95] : memref<16x128xf32, #tpu.memory_space<vmem>> -> memref<1x128xf32, #tpu.memory_space<vmem>>
    %143 = tpu.memref_slice %arg5[%c7_i32_92] : memref<16x!tpu.dma_semaphore, #tpu.memory_space<semaphore_mem>> -> memref<1x!tpu.dma_semaphore, #tpu.memory_space<semaphore_mem>>
    %144 = tpu.memref_squeeze %143 : memref<1x!tpu.dma_semaphore, #tpu.memory_space<semaphore_mem>> -> memref<!tpu.dma_semaphore, #tpu.memory_space<semaphore_mem>>
    tpu.wait_dma2 semaphore(%144 : memref<!tpu.dma_semaphore, #tpu.memory_space<semaphore_mem>>) src(%141 : memref<1x128xf32, #tpu.memory_space<any>>) dst(%142 : memref<1x128xf32, #tpu.memory_space<vmem>>)
    %c8_i32_96 = arith.constant 8 : i32
    %c0_i32_97 = arith.constant 0 : i32
    %145 = tpu.memref_slice %arg2[%59, %c0_i32_97] : memref<192x128xf32, #tpu.memory_space<any>> -> memref<1x128xf32, #tpu.memory_space<any>>
    %c8_i32_98 = arith.constant 8 : i32
    %c0_i32_99 = arith.constant 0 : i32
    %146 = tpu.memref_slice %arg4[%c8_i32_98, %c0_i32_99] : memref<16x128xf32, #tpu.memory_space<vmem>> -> memref<1x128xf32, #tpu.memory_space<vmem>>
    %147 = tpu.memref_slice %arg5[%c8_i32_96] : memref<16x!tpu.dma_semaphore, #tpu.memory_space<semaphore_mem>> -> memref<1x!tpu.dma_semaphore, #tpu.memory_space<semaphore_mem>>
    %148 = tpu.memref_squeeze %147 : memref<1x!tpu.dma_semaphore, #tpu.memory_space<semaphore_mem>> -> memref<!tpu.dma_semaphore, #tpu.memory_space<semaphore_mem>>
    tpu.wait_dma2 semaphore(%148 : memref<!tpu.dma_semaphore, #tpu.memory_space<semaphore_mem>>) src(%145 : memref<1x128xf32, #tpu.memory_space<any>>) dst(%146 : memref<1x128xf32, #tpu.memory_space<vmem>>)
    %c9_i32_100 = arith.constant 9 : i32
    %c0_i32_101 = arith.constant 0 : i32
    %149 = tpu.memref_slice %arg2[%66, %c0_i32_101] : memref<192x128xf32, #tpu.memory_space<any>> -> memref<1x128xf32, #tpu.memory_space<any>>
    %c9_i32_102 = arith.constant 9 : i32
    %c0_i32_103 = arith.constant 0 : i32
    %150 = tpu.memref_slice %arg4[%c9_i32_102, %c0_i32_103] : memref<16x128xf32, #tpu.memory_space<vmem>> -> memref<1x128xf32, #tpu.memory_space<vmem>>
    %151 = tpu.memref_slice %arg5[%c9_i32_100] : memref<16x!tpu.dma_semaphore, #tpu.memory_space<semaphore_mem>> -> memref<1x!tpu.dma_semaphore, #tpu.memory_space<semaphore_mem>>
    %152 = tpu.memref_squeeze %151 : memref<1x!tpu.dma_semaphore, #tpu.memory_space<semaphore_mem>> -> memref<!tpu.dma_semaphore, #tpu.memory_space<semaphore_mem>>
    tpu.wait_dma2 semaphore(%152 : memref<!tpu.dma_semaphore, #tpu.memory_space<semaphore_mem>>) src(%149 : memref<1x128xf32, #tpu.memory_space<any>>) dst(%150 : memref<1x128xf32, #tpu.memory_space<vmem>>)
    %c10_i32_104 = arith.constant 10 : i32
    %c0_i32_105 = arith.constant 0 : i32
    %153 = tpu.memref_slice %arg2[%73, %c0_i32_105] : memref<192x128xf32, #tpu.memory_space<any>> -> memref<1x128xf32, #tpu.memory_space<any>>
    %c10_i32_106 = arith.constant 10 : i32
    %c0_i32_107 = arith.constant 0 : i32
    %154 = tpu.memref_slice %arg4[%c10_i32_106, %c0_i32_107] : memref<16x128xf32, #tpu.memory_space<vmem>> -> memref<1x128xf32, #tpu.memory_space<vmem>>
    %155 = tpu.memref_slice %arg5[%c10_i32_104] : memref<16x!tpu.dma_semaphore, #tpu.memory_space<semaphore_mem>> -> memref<1x!tpu.dma_semaphore, #tpu.memory_space<semaphore_mem>>
    %156 = tpu.memref_squeeze %155 : memref<1x!tpu.dma_semaphore, #tpu.memory_space<semaphore_mem>> -> memref<!tpu.dma_semaphore, #tpu.memory_space<semaphore_mem>>
    tpu.wait_dma2 semaphore(%156 : memref<!tpu.dma_semaphore, #tpu.memory_space<semaphore_mem>>) src(%153 : memref<1x128xf32, #tpu.memory_space<any>>) dst(%154 : memref<1x128xf32, #tpu.memory_space<vmem>>)
    %c11_i32_108 = arith.constant 11 : i32
    %c0_i32_109 = arith.constant 0 : i32
    %157 = tpu.memref_slice %arg2[%80, %c0_i32_109] : memref<192x128xf32, #tpu.memory_space<any>> -> memref<1x128xf32, #tpu.memory_space<any>>
    %c11_i32_110 = arith.constant 11 : i32
    %c0_i32_111 = arith.constant 0 : i32
    %158 = tpu.memref_slice %arg4[%c11_i32_110, %c0_i32_111] : memref<16x128xf32, #tpu.memory_space<vmem>> -> memref<1x128xf32, #tpu.memory_space<vmem>>
    %159 = tpu.memref_slice %arg5[%c11_i32_108] : memref<16x!tpu.dma_semaphore, #tpu.memory_space<semaphore_mem>> -> memref<1x!tpu.dma_semaphore, #tpu.memory_space<semaphore_mem>>
    %160 = tpu.memref_squeeze %159 : memref<1x!tpu.dma_semaphore, #tpu.memory_space<semaphore_mem>> -> memref<!tpu.dma_semaphore, #tpu.memory_space<semaphore_mem>>
    tpu.wait_dma2 semaphore(%160 : memref<!tpu.dma_semaphore, #tpu.memory_space<semaphore_mem>>) src(%157 : memref<1x128xf32, #tpu.memory_space<any>>) dst(%158 : memref<1x128xf32, #tpu.memory_space<vmem>>)
    %c12_i32_112 = arith.constant 12 : i32
    %c0_i32_113 = arith.constant 0 : i32
    %161 = tpu.memref_slice %arg2[%87, %c0_i32_113] : memref<192x128xf32, #tpu.memory_space<any>> -> memref<1x128xf32, #tpu.memory_space<any>>
    %c12_i32_114 = arith.constant 12 : i32
    %c0_i32_115 = arith.constant 0 : i32
    %162 = tpu.memref_slice %arg4[%c12_i32_114, %c0_i32_115] : memref<16x128xf32, #tpu.memory_space<vmem>> -> memref<1x128xf32, #tpu.memory_space<vmem>>
    %163 = tpu.memref_slice %arg5[%c12_i32_112] : memref<16x!tpu.dma_semaphore, #tpu.memory_space<semaphore_mem>> -> memref<1x!tpu.dma_semaphore, #tpu.memory_space<semaphore_mem>>
    %164 = tpu.memref_squeeze %163 : memref<1x!tpu.dma_semaphore, #tpu.memory_space<semaphore_mem>> -> memref<!tpu.dma_semaphore, #tpu.memory_space<semaphore_mem>>
    tpu.wait_dma2 semaphore(%164 : memref<!tpu.dma_semaphore, #tpu.memory_space<semaphore_mem>>) src(%161 : memref<1x128xf32, #tpu.memory_space<any>>) dst(%162 : memref<1x128xf32, #tpu.memory_space<vmem>>)
    %c13_i32_116 = arith.constant 13 : i32
    %c0_i32_117 = arith.constant 0 : i32
    %165 = tpu.memref_slice %arg2[%94, %c0_i32_117] : memref<192x128xf32, #tpu.memory_space<any>> -> memref<1x128xf32, #tpu.memory_space<any>>
    %c13_i32_118 = arith.constant 13 : i32
    %c0_i32_119 = arith.constant 0 : i32
    %166 = tpu.memref_slice %arg4[%c13_i32_118, %c0_i32_119] : memref<16x128xf32, #tpu.memory_space<vmem>> -> memref<1x128xf32, #tpu.memory_space<vmem>>
    %167 = tpu.memref_slice %arg5[%c13_i32_116] : memref<16x!tpu.dma_semaphore, #tpu.memory_space<semaphore_mem>> -> memref<1x!tpu.dma_semaphore, #tpu.memory_space<semaphore_mem>>
    %168 = tpu.memref_squeeze %167 : memref<1x!tpu.dma_semaphore, #tpu.memory_space<semaphore_mem>> -> memref<!tpu.dma_semaphore, #tpu.memory_space<semaphore_mem>>
    tpu.wait_dma2 semaphore(%168 : memref<!tpu.dma_semaphore, #tpu.memory_space<semaphore_mem>>) src(%165 : memref<1x128xf32, #tpu.memory_space<any>>) dst(%166 : memref<1x128xf32, #tpu.memory_space<vmem>>)
    %c14_i32_120 = arith.constant 14 : i32
    %c0_i32_121 = arith.constant 0 : i32
    %169 = tpu.memref_slice %arg2[%101, %c0_i32_121] : memref<192x128xf32, #tpu.memory_space<any>> -> memref<1x128xf32, #tpu.memory_space<any>>
    %c14_i32_122 = arith.constant 14 : i32
    %c0_i32_123 = arith.constant 0 : i32
    %170 = tpu.memref_slice %arg4[%c14_i32_122, %c0_i32_123] : memref<16x128xf32, #tpu.memory_space<vmem>> -> memref<1x128xf32, #tpu.memory_space<vmem>>
    %171 = tpu.memref_slice %arg5[%c14_i32_120] : memref<16x!tpu.dma_semaphore, #tpu.memory_space<semaphore_mem>> -> memref<1x!tpu.dma_semaphore, #tpu.memory_space<semaphore_mem>>
    %172 = tpu.memref_squeeze %171 : memref<1x!tpu.dma_semaphore, #tpu.memory_space<semaphore_mem>> -> memref<!tpu.dma_semaphore, #tpu.memory_space<semaphore_mem>>
    tpu.wait_dma2 semaphore(%172 : memref<!tpu.dma_semaphore, #tpu.memory_space<semaphore_mem>>) src(%169 : memref<1x128xf32, #tpu.memory_space<any>>) dst(%170 : memref<1x128xf32, #tpu.memory_space<vmem>>)
    %c15_i32_124 = arith.constant 15 : i32
    %c0_i32_125 = arith.constant 0 : i32
    %173 = tpu.memref_slice %arg2[%108, %c0_i32_125] : memref<192x128xf32, #tpu.memory_space<any>> -> memref<1x128xf32, #tpu.memory_space<any>>
    %c15_i32_126 = arith.constant 15 : i32
    %c0_i32_127 = arith.constant 0 : i32
    %174 = tpu.memref_slice %arg4[%c15_i32_126, %c0_i32_127] : memref<16x128xf32, #tpu.memory_space<vmem>> -> memref<1x128xf32, #tpu.memory_space<vmem>>
    %175 = tpu.memref_slice %arg5[%c15_i32_124] : memref<16x!tpu.dma_semaphore, #tpu.memory_space<semaphore_mem>> -> memref<1x!tpu.dma_semaphore, #tpu.memory_space<semaphore_mem>>
    %176 = tpu.memref_squeeze %175 : memref<1x!tpu.dma_semaphore, #tpu.memory_space<semaphore_mem>> -> memref<!tpu.dma_semaphore, #tpu.memory_space<semaphore_mem>>
    tpu.wait_dma2 semaphore(%176 : memref<!tpu.dma_semaphore, #tpu.memory_space<semaphore_mem>>) src(%173 : memref<1x128xf32, #tpu.memory_space<any>>) dst(%174 : memref<1x128xf32, #tpu.memory_space<vmem>>)
    %c0 = arith.constant 0 : index
    %c0_128 = arith.constant 0 : index
    %177 = vector.load %arg4[%c0, %c0_128] : memref<16x128xf32, #tpu.memory_space<vmem>>, vector<16x128xf32>
    %c0_129 = arith.constant 0 : index
    %c0_130 = arith.constant 0 : index
    %178 = vector.load %arg3[%c0_129, %c0_130] : memref<16x128xf32, #tpu.memory_space<vmem>>, vector<16x128xf32>
    tpu.vector_store %arg3[%c0_129, %c0_130], %177 {strides = array<i32>} : memref<16x128xf32, #tpu.memory_space<vmem>>, vector<16x128xf32>,
    return
  }
  func.func @transform_1(%arg0: i32, %arg1: memref<48xi32, #tpu.memory_space<smem>>) -> (i32, i32) {
    %c0_i32 = arith.constant 0 : i32
    %c0_i32_0 = arith.constant 0 : i32
    return %arg0, %c0_i32 : i32, i32
  }
}

</mosaic_0001>

<bundles_post_ra>
// kernel: tpu_custom_call.1
= control target key start
LH: loop header
LB: loop body
LE: loop exit
PB: predicated region body
PF: predicated region fallthrough
CT: control target
= control target key end

     0   :  { %s1132_s12 = smov [#allocation5]   ;;  %s1431_s0 = inlined_call_operand.hbm [shape: s32[48], index: 0, kind: input, shape index: {}]   ;;  %s1432_s1 = inlined_call_operand.hbm [shape: f32[192,128], index: 1, kind: input, shape index: {}]   ;;  %s1433_s2 = inlined_call_operand.hbm [shape: f32[48,128], index: 2, kind: output, shape index: {}]  }
   0x1   :  { %s8_s11 = sshll.u32 %s1431_s0, 4  ;;  %s9_s11 = int_to_ptr.hbm [resolvable:$true] %s8_s11 }
   0x2   :  { %11 = dma.hbm_to_smem %s9_s11, 16, %s1132_s12, [#allocation4] }
   0x3   :  { %1082 = dma.done.wait [#allocation4], 16 }
   0x4   :  { %1083 = vsyncadd [#allocation4], 4294967280 }
   0x5   :  { %14 = sfence }
   0x6   :  { %15 = vsyncpa [#allocation7], 0 }
   0x7   :  { %17 = vsyncpa [#allocation7 + $0x1], 0  ;;  %s1169_s13 = smov 0   ;;  %s1171_s14 = smov 0  }
   0x8   :  { %s1173_s15 = smov 0  }
   0x9 LB: > { %s569_s0 = sadd.s32 4294967295, %s1130_s15   ;;  %s1186_s16 = sadd.s32 1, %s1130_s15   ;;  %s1130_s15 = sphi %s1173_s15, %s1438_s15   ;;  %s1126_s14 = sphi %s1171_s14, %s1437_s14   ;;  %s1122_s13 = sphi %s1169_s13, %s1436_s13  }
   0xa   : > { %s26_s17 = ssub.s32 %s1130_s15, %s1186_s16  ;;  %s29_s18 = sadd.s32 1, %s1126_s14 }
   0xb   : > { %p27_p0 = scmp.eq.s32.totalorder %s26_s17, 0  ;;  %p570_p1 = scmp.ne.s32.totalorder %s26_s17, 0 }
   0xc   : > { %p33_p2 = scmp.eq.s32.totalorder %s1130_s15, 2  ;;  %p38_p3 = scmp.ne.s32.totalorder %s1126_s14, %s1122_s13 }
   0xd   : > { %s1195_s19 = scalar_select %p27_p0, %s1126_s14, %s29_s18  }
   0xe   : > { %p1197_p4 = por %p570_p1, %p33_p2  ;;  %p39_p5 = scmp.eq.s32.totalorder %s569_s0, 2 }
   0xf   : > { %p571_p7 = scmp.ge.s32.totalorder %s1130_s15, 3 }
  0x10   : > { %p1201_p6 = por %p39_p5, %p38_p3  ;;  %s53_s22 = sand.u32 (!%p571_p7), 1, %s1126_s14  }
  0x11   : > { %48 = sbr.rel (%p571_p7) target bundleno = 279 (0x117), region = 12  ;;  %s1208_s23 = sshll.u32 (!%p571_p7), %s1130_s15, 4 }
  0x12   : > { %s1212_s24 = sshll.u32 (!%p571_p7), %s53_s22, 4  ;;  %s58_s25 = sld [smem:[#allocation5 + %s1208_s23]] (!%p571_p7) }
  0x13   : > { %s1133_s26 = smov (!%p571_p7), [#allocation2]   ;;  %s73_s28 = sadd.s32 (!%p571_p7), 1, %s1208_s23 }
  0x14   : > { %s69_s27 = sshll.u32 (!%p571_p7), %s1133_s26, 4  ;;  %s74_s29 = sld [smem:[#allocation5 + %s73_s28]] (!%p571_p7)  ;;  %s70_s27 = int_to_ptr.vmem [resolvable:$true] %s69_s27 }
  0x15   : > { %s91_s30 = sadd.s32 (!%p571_p7), 2, %s1208_s23  ;;  %s1134_s3 = smov (!%p571_p7), [#allocation2 + $0x1]  }
  0x16   : > { %s1217_s4 = sshll.u32 %s1134_s3, 4  ;;  %s92_s5 = sld [smem:[#allocation5 + %s91_s30]]  ;;  %s88_s4 = int_to_ptr.vmem [resolvable:$true] %s1217_s4 }
  0x17   : > { %s1135_s10 = smov [#allocation2 + $0x2]   ;;  %s1228_s26 = scalar_lea.hbm %s1432_s1, 192 }
  0x18   : > { %s59_s8 = scalar_lea.hbm %s1432_s1, %s58_s25  ;;  %s1223_s11 = sshll.u32 %s1135_s10, 4  ;;  %s106_s11 = int_to_ptr.vmem [resolvable:$true] %s1223_s11 }
  0x19   : > { %s67_s9 = sshll.u32 %s59_s8, 4  ;;  %s68_s9 = int_to_ptr.hbm [resolvable:$true] %s67_s9 }
  0x1a   : > { %s658_s12 = sshra.s32 %s68_s9, 4  ;;  %s659_s12 = int_to_ptr.hbm [resolvable:$true] %s658_s12 }
  0x1b   : > { %s660_s0 = scalar_lea.hbm %s659_s12, 1  ;;  %p663_p9 = scmp.lt.s32.totalorder %s659_s12, %s1432_s1 }
  0x1c   : > { %p661_p8 = scmp.ne.s32.totalorder %s659_s12, %s660_s0  ;;  %p664_p10 = scmp.lt.s32.totalorder %s1228_s26, %s660_s0 }
  0x1e   : > { %p665_p11 = por %p664_p10, %p663_p9 }
  0x20   : > { %p666_p12 = pnand %p665_p11, %p661_p8 }
  0x22   : > { %669 = shalt.err (!%p666_p12)  }
  0x23   : > { %72 = dma.hbm_to_vmem [thread:$0]  %s68_s9, 16, %s70_s27, [#allocation3] }
  0x24   : > { %s75_s6 = scalar_lea.hbm %s1432_s1, %s74_s29  ;;  %s93_s17 = scalar_lea.hbm %s1432_s1, %s92_s5 }
  0x25   : > { %s85_s7 = sshll.u32 %s75_s6, 4  ;;  %s103_s18 = sshll.u32 %s93_s17, 4  ;;  %s86_s7 = int_to_ptr.hbm [resolvable:$true] %s85_s7  ;;  %s104_s18 = int_to_ptr.hbm [resolvable:$true] %s103_s18 }
  0x26   : > { %s682_s12 = sshra.s32 %s86_s7, 4  ;;  %s683_s12 = int_to_ptr.hbm [resolvable:$true] %s682_s12 }
  0x27   : > { %s684_s0 = scalar_lea.hbm %s683_s12, 1  ;;  %p687_p0 = scmp.lt.s32.totalorder %s683_s12, %s1432_s1 }
  0x28   : > { %p685_p13 = scmp.ne.s32.totalorder %s683_s12, %s684_s0  ;;  %p688_p1 = scmp.lt.s32.totalorder %s1228_s26, %s684_s0 }
  0x2a   : > { %p689_p2 = por %p688_p1, %p687_p0 }
  0x2c   : > { %p690_p3 = pnand %p689_p2, %p685_p13 }
  0x2e   : > { %693 = shalt.err (!%p690_p3)  }
  0x2f   : > { %90 = dma.hbm_to_vmem [thread:$0]  %s86_s7, 16, %s88_s4, [#allocation3 + $0x1] }
  0x30   : > { %s109_s29 = sadd.s32 3, %s1208_s23  ;;  %s706_s5 = sshra.s32 %s104_s18, 4  ;;  %s707_s5 = int_to_ptr.hbm [resolvable:$true] %s706_s5 }
  0x31   : > { %s708_s9 = scalar_lea.hbm %s707_s5, 1  ;;  %p711_p7 = scmp.lt.s32.totalorder %s707_s5, %s1432_s1 }
  0x32   : > { %p709_p5 = scmp.ne.s32.totalorder %s707_s5, %s708_s9  ;;  %p712_p8 = scmp.lt.s32.totalorder %s1228_s26, %s708_s9 }
  0x34   : > { %p713_p9 = por %p712_p8, %p711_p7 }
  0x36   : > { %p714_p10 = pnand %p713_p9, %p709_p5 }
  0x38   : > { %717 = shalt.err (!%p714_p10)  }
  0x39   : > { %108 = dma.hbm_to_vmem [thread:$0]  %s104_s18, 16, %s106_s11, [#allocation3 + $0x2] }
  0x3a   : > { %s110_s3 = sld [smem:[#allocation5 + %s109_s29]]  ;;  %s1136_s6 = smov [#allocation2 + $0x3]  }
  0x3b   : > { %s123_s4 = sshll.u32 %s1136_s6, 4  ;;  %s127_s7 = sadd.s32 4, %s1208_s23  ;;  %s124_s4 = int_to_ptr.vmem [resolvable:$true] %s123_s4 }
  0x3c   : > { %s128_s8 = sld [smem:[#allocation5 + %s127_s7]]  ;;  %s145_s10 = sadd.s32 5, %s1208_s23 }
  0x3d   : > { %s1137_s17 = smov [#allocation2 + $0x4]   ;;  %s146_s0 = sld [smem:[#allocation5 + %s145_s10]] }
  0x3e   : > { %s1254_s12 = sshll.u32 %s1137_s17, 4  ;;  %s1138_s18 = smov [#allocation2 + $0x5]   ;;  %s142_s12 = int_to_ptr.vmem [resolvable:$true] %s1254_s12 }
  0x3f   : > { %s1260_s5 = sshll.u32 %s1138_s18, 4  ;;  %s160_s5 = int_to_ptr.vmem [resolvable:$true] %s1260_s5 }
  0x40   : > { %s111_s11 = scalar_lea.hbm %s1432_s1, %s110_s3 }
  0x41   : > { %s121_s29 = sshll.u32 %s111_s11, 4  ;;  %s122_s29 = int_to_ptr.hbm [resolvable:$true] %s121_s29 }
  0x42   : > { %s129_s25 = scalar_lea.hbm %s1432_s1, %s128_s8  ;;  %s730_s6 = sshra.s32 %s122_s29, 4  ;;  %s731_s6 = int_to_ptr.hbm [resolvable:$true] %s730_s6 }
  0x43   : > { %s732_s7 = scalar_lea.hbm %s731_s6, 1  ;;  %p735_p12 = scmp.lt.s32.totalorder %s731_s6, %s1432_s1 }
  0x44   : > { %p733_p11 = scmp.ne.s32.totalorder %s731_s6, %s732_s7  ;;  %p736_p13 = scmp.lt.s32.totalorder %s1228_s26, %s732_s7 }
  0x46   : > { %p737_p0 = por %p736_p13, %p735_p12 }
  0x48   : > { %p738_p1 = pnand %p737_p0, %p733_p11 }
  0x4a   : > { %741 = shalt.err (!%p738_p1)  }
  0x4b   : > { %126 = dma.hbm_to_vmem [thread:$0]  %s122_s29, 16, %s124_s4, [#allocation3 + $0x3] }
  0x4c   : > { %s139_s3 = sshll.u32 %s129_s25, 4  ;;  %s147_s11 = scalar_lea.hbm %s1432_s1, %s146_s0  ;;  %s140_s3 = int_to_ptr.hbm [resolvable:$true] %s139_s3 }
  0x4d   : > { %s157_s8 = sshll.u32 %s147_s11, 4  ;;  %s754_s18 = sshra.s32 %s140_s3, 4  ;;  %s755_s18 = int_to_ptr.hbm [resolvable:$true] %s754_s18  ;;  %s158_s8 = int_to_ptr.hbm [resolvable:$true] %s157_s8 }
  0x4e   : > { %s756_s9 = scalar_lea.hbm %s755_s18, 1  ;;  %p759_p3 = scmp.lt.s32.totalorder %s755_s18, %s1432_s1 }
  0x4f   : > { %p757_p2 = scmp.ne.s32.totalorder %s755_s18, %s756_s9  ;;  %p760_p5 = scmp.lt.s32.totalorder %s1228_s26, %s756_s9 }
  0x51   : > { %p761_p7 = por %p760_p5, %p759_p3 }
  0x53   : > { %p762_p8 = pnand %p761_p7, %p757_p2 }
  0x55   : > { %765 = shalt.err (!%p762_p8)  }
  0x56   : > { %144 = dma.hbm_to_vmem [thread:$0]  %s140_s3, 16, %s142_s12, [#allocation3 + $0x4] }
  0x57   : > { %s163_s4 = sadd.s32 6, %s1208_s23  ;;  %s778_s0 = sshra.s32 %s158_s8, 4  ;;  %s779_s0 = int_to_ptr.hbm [resolvable:$true] %s778_s0 }
  0x58   : > { %s780_s29 = scalar_lea.hbm %s779_s0, 1  ;;  %p783_p10 = scmp.lt.s32.totalorder %s779_s0, %s1432_s1 }
  0x59   : > { %p781_p9 = scmp.ne.s32.totalorder %s779_s0, %s780_s29  ;;  %p784_p11 = scmp.lt.s32.totalorder %s1228_s26, %s780_s29 }
  0x5b   : > { %p785_p12 = por %p784_p11, %p783_p10 }
  0x5d   : > { %p786_p13 = pnand %p785_p12, %p781_p9 }
  0x5f   : > { %789 = shalt.err (!%p786_p13)  }
  0x60   : > { %162 = dma.hbm_to_vmem [thread:$0]  %s158_s8, 16, %s160_s5, [#allocation3 + $0x5] }
  0x61   : > { %s164_s12 = sld [smem:[#allocation5 + %s163_s4]]  ;;  %s1139_s7 = smov [#allocation2 + $0x6]  }
  0x62   : > { %s177_s17 = sshll.u32 %s1139_s7, 4  ;;  %s181_s3 = sadd.s32 7, %s1208_s23  ;;  %s178_s17 = int_to_ptr.vmem [resolvable:$true] %s177_s17 }
  0x63   : > { %s182_s28 = sld [smem:[#allocation5 + %s181_s3]]  ;;  %s199_s27 = sadd.s32 8, %s1208_s23 }
  0x64   : > { %s1140_s11 = smov [#allocation2 + $0x7]   ;;  %s200_s9 = sld [smem:[#allocation5 + %s199_s27]] }
  0x65   : > { %s1288_s18 = sshll.u32 %s1140_s11, 4  ;;  %s1141_s29 = smov [#allocation2 + $0x8]   ;;  %s196_s18 = int_to_ptr.vmem [resolvable:$true] %s1288_s18 }
  0x66   : > { %s1294_s5 = sshll.u32 %s1141_s29, 4  ;;  %s214_s5 = int_to_ptr.vmem [resolvable:$true] %s1294_s5 }
  0x67   : > { %s165_s0 = scalar_lea.hbm %s1432_s1, %s164_s12 }
  0x68   : > { %s175_s8 = sshll.u32 %s165_s0, 4  ;;  %s176_s8 = int_to_ptr.hbm [resolvable:$true] %s175_s8 }
  0x69   : > { %s183_s6 = scalar_lea.hbm %s1432_s1, %s182_s28  ;;  %s802_s7 = sshra.s32 %s176_s8, 4  ;;  %s803_s7 = int_to_ptr.hbm [resolvable:$true] %s802_s7 }
  0x6a   : > { %s804_s3 = scalar_lea.hbm %s803_s7, 1  ;;  %p807_p1 = scmp.lt.s32.totalorder %s803_s7, %s1432_s1 }
  0x6b   : > { %p805_p0 = scmp.ne.s32.totalorder %s803_s7, %s804_s3  ;;  %p808_p2 = scmp.lt.s32.totalorder %s1228_s26, %s804_s3 }
  0x6d   : > { %p809_p3 = por %p808_p2, %p807_p1 }
  0x6f   : > { %p810_p5 = pnand %p809_p3, %p805_p0 }
  0x71   : > { %813 = shalt.err (!%p810_p5)  }
  0x72   : > { %180 = dma.hbm_to_vmem [thread:$0]  %s176_s8, 16, %s178_s17, [#allocation3 + $0x6] }
  0x73   : > { %s193_s12 = sshll.u32 %s183_s6, 4  ;;  %s201_s0 = scalar_lea.hbm %s1432_s1, %s200_s9  ;;  %s194_s12 = int_to_ptr.hbm [resolvable:$true] %s193_s12 }
  0x74   : > { %s211_s28 = sshll.u32 %s201_s0, 4  ;;  %s826_s29 = sshra.s32 %s194_s12, 4  ;;  %s827_s29 = int_to_ptr.hbm [resolvable:$true] %s826_s29  ;;  %s212_s28 = int_to_ptr.hbm [resolvable:$true] %s211_s28 }
  0x75   : > { %s828_s4 = scalar_lea.hbm %s827_s29, 1  ;;  %p831_p8 = scmp.lt.s32.totalorder %s827_s29, %s1432_s1 }
  0x76   : > { %p829_p7 = scmp.ne.s32.totalorder %s827_s29, %s828_s4  ;;  %p832_p9 = scmp.lt.s32.totalorder %s1228_s26, %s828_s4 }
  0x78   : > { %p833_p10 = por %p832_p9, %p831_p8 }
  0x7a   : > { %p834_p11 = pnand %p833_p10, %p829_p7 }
  0x7c   : > { %837 = shalt.err (!%p834_p11)  }
  0x7d   : > { %198 = dma.hbm_to_vmem [thread:$0]  %s194_s12, 16, %s196_s18, [#allocation3 + $0x7] }
  0x7e   : > { %s217_s17 = sadd.s32 9, %s1208_s23  ;;  %s850_s9 = sshra.s32 %s212_s28, 4  ;;  %s851_s9 = int_to_ptr.hbm [resolvable:$true] %s850_s9 }
  0x7f   : > { %s852_s8 = scalar_lea.hbm %s851_s9, 1  ;;  %p855_p13 = scmp.lt.s32.totalorder %s851_s9, %s1432_s1 }
  0x80   : > { %p853_p12 = scmp.ne.s32.totalorder %s851_s9, %s852_s8  ;;  %p856_p0 = scmp.lt.s32.totalorder %s1228_s26, %s852_s8 }
  0x82   : > { %p857_p1 = por %p856_p0, %p855_p13 }
  0x84   : > { %p858_p2 = pnand %p857_p1, %p853_p12 }
  0x86   : > { %861 = shalt.err (!%p858_p2)  }
  0x87   : > { %216 = dma.hbm_to_vmem [thread:$0]  %s212_s28, 16, %s214_s5, [#allocation3 + $0x8] }
  0x88   : > { %s218_s18 = sld [smem:[#allocation5 + %s217_s17]]  ;;  %s1142_s3 = smov [#allocation2 + $0x9]  }
  0x89   : > { %s231_s11 = sshll.u32 %s1142_s3, 4  ;;  %s235_s12 = sadd.s32 10, %s1208_s23  ;;  %s232_s11 = int_to_ptr.vmem [resolvable:$true] %s231_s11 }
  0x8a   : > { %s236_s30 = sld [smem:[#allocation5 + %s235_s12]]  ;;  %s253_s10 = sadd.s32 11, %s1208_s23 }
  0x8b   : > { %s1143_s0 = smov [#allocation2 + $0xa]   ;;  %s254_s4 = sld [smem:[#allocation5 + %s253_s10]] }
  0x8c   : > { %s1322_s29 = sshll.u32 %s1143_s0, 4  ;;  %s1144_s8 = smov [#allocation2 + $0xb]   ;;  %s250_s29 = int_to_ptr.vmem [resolvable:$true] %s1322_s29 }
  0x8d   : > { %s1328_s5 = sshll.u32 %s1144_s8, 4  ;;  %s268_s5 = int_to_ptr.vmem [resolvable:$true] %s1328_s5 }
  0x8e   : > { %s219_s9 = scalar_lea.hbm %s1432_s1, %s218_s18 }
  0x8f   : > { %s229_s28 = sshll.u32 %s219_s9, 4  ;;  %s230_s28 = int_to_ptr.hbm [resolvable:$true] %s229_s28 }
  0x90   : > { %s237_s7 = scalar_lea.hbm %s1432_s1, %s236_s30  ;;  %s874_s3 = sshra.s32 %s230_s28, 4  ;;  %s875_s3 = int_to_ptr.hbm [resolvable:$true] %s874_s3 }
  0x91   : > { %s876_s12 = scalar_lea.hbm %s875_s3, 1  ;;  %p879_p5 = scmp.lt.s32.totalorder %s875_s3, %s1432_s1 }
  0x92   : > { %p877_p3 = scmp.ne.s32.totalorder %s875_s3, %s876_s12  ;;  %p880_p7 = scmp.lt.s32.totalorder %s1228_s26, %s876_s12 }
  0x94   : > { %p881_p8 = por %p880_p7, %p879_p5 }
  0x96   : > { %p882_p9 = pnand %p881_p8, %p877_p3 }
  0x98   : > { %885 = shalt.err (!%p882_p9)  }
  0x99   : > { %234 = dma.hbm_to_vmem [thread:$0]  %s230_s28, 16, %s232_s11, [#allocation3 + $0x9] }
  0x9a   : > { %s247_s18 = sshll.u32 %s237_s7, 4  ;;  %s255_s9 = scalar_lea.hbm %s1432_s1, %s254_s4  ;;  %s248_s18 = int_to_ptr.hbm [resolvable:$true] %s247_s18 }
  0x9b   : > { %s265_s30 = sshll.u32 %s255_s9, 4  ;;  %s898_s8 = sshra.s32 %s248_s18, 4  ;;  %s899_s8 = int_to_ptr.hbm [resolvable:$true] %s898_s8  ;;  %s266_s30 = int_to_ptr.hbm [resolvable:$true] %s265_s30 }
  0x9c   : > { %s900_s17 = scalar_lea.hbm %s899_s8, 1  ;;  %p903_p11 = scmp.lt.s32.totalorder %s899_s8, %s1432_s1 }
  0x9d   : > { %p901_p10 = scmp.ne.s32.totalorder %s899_s8, %s900_s17  ;;  %p904_p12 = scmp.lt.s32.totalorder %s1228_s26, %s900_s17 }
  0x9f   : > { %p905_p13 = por %p904_p12, %p903_p11 }
  0xa1   : > { %p906_p0 = pnand %p905_p13, %p901_p10 }
  0xa3   : > { %909 = shalt.err (!%p906_p0)  }
  0xa4   : > { %252 = dma.hbm_to_vmem [thread:$0]  %s248_s18, 16, %s250_s29, [#allocation3 + $0xa] }
  0xa5   : > { %s271_s11 = sadd.s32 12, %s1208_s23  ;;  %s922_s4 = sshra.s32 %s266_s30, 4  ;;  %s923_s4 = int_to_ptr.hbm [resolvable:$true] %s922_s4 }
  0xa6   : > { %s924_s28 = scalar_lea.hbm %s923_s4, 1  ;;  %p927_p2 = scmp.lt.s32.totalorder %s923_s4, %s1432_s1 }
  0xa7   : > { %p925_p1 = scmp.ne.s32.totalorder %s923_s4, %s924_s28  ;;  %p928_p3 = scmp.lt.s32.totalorder %s1228_s26, %s924_s28 }
  0xa9   : > { %p929_p5 = por %p928_p3, %p927_p2 }
  0xab   : > { %p930_p7 = pnand %p929_p5, %p925_p1 }
  0xad   : > { %933 = shalt.err (!%p930_p7)  }
  0xae   : > { %270 = dma.hbm_to_vmem [thread:$0]  %s266_s30, 16, %s268_s5, [#allocation3 + $0xb] }
  0xaf   : > { %s272_s29 = sld [smem:[#allocation5 + %s271_s11]]  ;;  %s1145_s12 = smov [#allocation2 + $0xc]  }
  0xb0   : > { %s285_s0 = sshll.u32 %s1145_s12, 4  ;;  %s289_s18 = sadd.s32 13, %s1208_s23  ;;  %s286_s0 = int_to_ptr.vmem [resolvable:$true] %s285_s0 }
  0xb1   : > { %s290_s25 = sld [smem:[#allocation5 + %s289_s18]]  ;;  %s307_s27 = sadd.s32 14, %s1208_s23 }
  0xb2   : > { %s1146_s9 = smov [#allocation2 + $0xd]   ;;  %s308_s17 = sld [smem:[#allocation5 + %s307_s27]] }
  0xb3   : > { %s1356_s8 = sshll.u32 %s1146_s9, 4  ;;  %s1147_s28 = smov [#allocation2 + $0xe]   ;;  %s304_s8 = int_to_ptr.vmem [resolvable:$true] %s1356_s8 }
  0xb4   : > { %s1362_s5 = sshll.u32 %s1147_s28, 4  ;;  %s322_s5 = int_to_ptr.vmem [resolvable:$true] %s1362_s5 }
  0xb5   : > { %s273_s4 = scalar_lea.hbm %s1432_s1, %s272_s29 }
  0xb6   : > { %s283_s30 = sshll.u32 %s273_s4, 4  ;;  %s284_s30 = int_to_ptr.hbm [resolvable:$true] %s283_s30 }
  0xb7   : > { %s291_s3 = scalar_lea.hbm %s1432_s1, %s290_s25  ;;  %s946_s12 = sshra.s32 %s284_s30, 4  ;;  %s947_s12 = int_to_ptr.hbm [resolvable:$true] %s946_s12 }
  0xb8   : > { %s948_s18 = scalar_lea.hbm %s947_s12, 1  ;;  %p951_p9 = scmp.lt.s32.totalorder %s947_s12, %s1432_s1 }
  0xb9   : > { %p949_p8 = scmp.ne.s32.totalorder %s947_s12, %s948_s18  ;;  %p952_p10 = scmp.lt.s32.totalorder %s1228_s26, %s948_s18 }
  0xbb   : > { %p953_p11 = por %p952_p10, %p951_p9 }
  0xbd   : > { %p954_p12 = pnand %p953_p11, %p949_p8 }
  0xbf   : > { %957 = shalt.err (!%p954_p12)  }
  0xc0   : > { %288 = dma.hbm_to_vmem [thread:$0]  %s284_s30, 16, %s286_s0, [#allocation3 + $0xc] }
  0xc1   : > { %s301_s29 = sshll.u32 %s291_s3, 4  ;;  %s309_s4 = scalar_lea.hbm %s1432_s1, %s308_s17  ;;  %s302_s29 = int_to_ptr.hbm [resolvable:$true] %s301_s29 }
  0xc2   : > { %s319_s25 = sshll.u32 %s309_s4, 4  ;;  %s970_s28 = sshra.s32 %s302_s29, 4  ;;  %s971_s28 = int_to_ptr.hbm [resolvable:$true] %s970_s28  ;;  %s320_s25 = int_to_ptr.hbm [resolvable:$true] %s319_s25 }
  0xc3   : > { %s972_s11 = scalar_lea.hbm %s971_s28, 1  ;;  %p975_p0 = scmp.lt.s32.totalorder %s971_s28, %s1432_s1 }
  0xc4   : > { %p973_p13 = scmp.ne.s32.totalorder %s971_s28, %s972_s11  ;;  %p976_p1 = scmp.lt.s32.totalorder %s1228_s26, %s972_s11 }
  0xc6   : > { %p977_p2 = por %p976_p1, %p975_p0 }
  0xc8   : > { %p978_p3 = pnand %p977_p2, %p973_p13 }
  0xca   : > { %981 = shalt.err (!%p978_p3)  }
  0xcb   : > { %306 = dma.hbm_to_vmem [thread:$0]  %s302_s29, 16, %s304_s8, [#allocation3 + $0xd] }
  0xcc   : > { %s325_s0 = sadd.s32 15, %s1208_s23  ;;  %s994_s17 = sshra.s32 %s320_s25, 4  ;;  %s995_s17 = int_to_ptr.hbm [resolvable:$true] %s994_s17 }
  0xcd   : > { %s996_s30 = scalar_lea.hbm %s995_s17, 1  ;;  %p999_p7 = scmp.lt.s32.totalorder %s995_s17, %s1432_s1 }
  0xce   : > { %p997_p5 = scmp.ne.s32.totalorder %s995_s17, %s996_s30  ;;  %p1000_p8 = scmp.lt.s32.totalorder %s1228_s26, %s996_s30 }
  0xd0   : > { %p1001_p9 = por %p1000_p8, %p999_p7 }
  0xd2   : > { %p1002_p10 = pnand %p1001_p9, %p997_p5 }
  0xd4   : > { %1005 = shalt.err (!%p1002_p10)  }
  0xd5   : > { %324 = dma.hbm_to_vmem [thread:$0]  %s320_s25, 16, %s322_s5, [#allocation3 + $0xe] }
  0xd6   : > { %s326_s18 = sld [smem:[#allocation5 + %s325_s0]]  ;;  %s1148_s8 = smov [#allocation2 + $0xf]  }
  0xd7   : > { %s339_s9 = sshll.u32 %s1148_s8, 4  ;;  %s340_s9 = int_to_ptr.vmem [resolvable:$true] %s339_s9 }
  0xdc   : > { %s327_s10 = scalar_lea.hbm %s1432_s1, %s326_s18 }
  0xdd   : > { %s337_s4 = sshll.u32 %s327_s10, 4  ;;  %s338_s4 = int_to_ptr.hbm [resolvable:$true] %s337_s4 }
  0xde   : > { %s1018_s28 = sshra.s32 %s338_s4, 4  ;;  %s1019_s28 = int_to_ptr.hbm [resolvable:$true] %s1018_s28 }
  0xdf   : > { %s1020_s11 = scalar_lea.hbm %s1019_s28, 1  ;;  %p1023_p12 = scmp.lt.s32.totalorder %s1019_s28, %s1432_s1 }
  0xe0   : > { %p1021_p11 = scmp.ne.s32.totalorder %s1019_s28, %s1020_s11  ;;  %p1024_p13 = scmp.lt.s32.totalorder %s1228_s26, %s1020_s11 }
  0xe2   : > { %p1025_p0 = por %p1024_p13, %p1023_p12 }
  0xe4   : > { %p1026_p1 = pnand %p1025_p0, %p1021_p11 }
  0xe6   : > { %1029 = shalt.err (!%p1026_p1)  }
  0xe7   : > { %342 = dma.hbm_to_vmem [thread:$0]  %s338_s4, 16, %s340_s9, [#allocation3 + $0xf] }
  0xe8   : > { %s1396_s5 = scalar_lea.vmem [#allocation6], %s1212_s24 }
  0xe9   : > { %1084 = dma.done.wait [#allocation3], 16 }
  0xea   : > { %1085 = vsyncadd [#allocation3], 4294967280 }
  0xeb   : > { %1086 = dma.done.wait [#allocation3 + $0x1], 16 }
  0xec   : > { %1087 = vsyncadd [#allocation3 + $0x1], 4294967280 }
  0xed   : > { %1088 = dma.done.wait [#allocation3 + $0x2], 16 }
  0xee   : > { %1089 = vsyncadd [#allocation3 + $0x2], 4294967280 }
  0xef   : > { %1090 = dma.done.wait [#allocation3 + $0x3], 16 }
  0xf0   : > { %1091 = vsyncadd [#allocation3 + $0x3], 4294967280 }
  0xf1   : > { %1092 = dma.done.wait [#allocation3 + $0x4], 16 }
  0xf2   : > { %1093 = vsyncadd [#allocation3 + $0x4], 4294967280 }
  0xf3   : > { %1094 = dma.done.wait [#allocation3 + $0x5], 16 }
  0xf4   : > { %1095 = vsyncadd [#allocation3 + $0x5], 4294967280 }
  0xf5   : > { %1096 = dma.done.wait [#allocation3 + $0x6], 16 }
  0xf6   : > { %1097 = vsyncadd [#allocation3 + $0x6], 4294967280 }
  0xf7   : > { %1098 = dma.done.wait [#allocation3 + $0x7], 16 }
  0xf8   : > { %1099 = vsyncadd [#allocation3 + $0x7], 4294967280 }
  0xf9   : > { %1100 = dma.done.wait [#allocation3 + $0x8], 16 }
  0xfa   : > { %1101 = vsyncadd [#allocation3 + $0x8], 4294967280 }
  0xfb   : > { %1102 = dma.done.wait [#allocation3 + $0x9], 16 }
  0xfc   : > { %1103 = vsyncadd [#allocation3 + $0x9], 4294967280 }
  0xfd   : > { %1104 = dma.done.wait [#allocation3 + $0xa], 16 }
  0xfe   : > { %1105 = vsyncadd [#allocation3 + $0xa], 4294967280 }
  0xff   : > { %1106 = dma.done.wait [#allocation3 + $0xb], 16 }
 0x100   : > { %1107 = vsyncadd [#allocation3 + $0xb], 4294967280 }
 0x101   : > { %1108 = dma.done.wait [#allocation3 + $0xc], 16 }
 0x102   : > { %1109 = vsyncadd [#allocation3 + $0xc], 4294967280 }
 0x103   : > { %1110 = dma.done.wait [#allocation3 + $0xd], 16 }
 0x104   : > { %1111 = vsyncadd [#allocation3 + $0xd], 4294967280 }
 0x105   : > { %1112 = dma.done.wait [#allocation3 + $0xe], 16 }
 0x106   : > { %1113 = vsyncadd [#allocation3 + $0xe], 4294967280 }
 0x107   : > { %1114 = dma.done.wait [#allocation3 + $0xf], 16 }
 0x108   : > { %1115 = vsyncadd [#allocation3 + $0xf], 4294967280  ;;  %s392_s25 = scalar_lea.hbm %s1433_s2, %s1208_s23  ;;  %s393_s0 = sshll.u32 %s1396_s5, 4  ;;  %v376_v0 = vld [vmem:[#allocation2] sm:$0xff]  ;;  %v377_v1 = vld [vmem:[#allocation2 + $0x8] sm:$0xff]  ;;  %s394_s0 = int_to_ptr.vmem [resolvable:$true] %s393_s0 }
 0x109   : > { %s395_s17 = sshll.u32 %s392_s25, 4  ;;  %378 = vst [vmem:[%s1396_s5] sm:$0xff] %v376_v0  ;;  %s381_s30 = scalar_lea.sflag [#allocation7], %s53_s22  ;;  %s396_s17 = int_to_ptr.hbm [resolvable:$true] %s395_s17 }
 0x10a   : > { %379 = vst [vmem:[%s1396_s5 + $0x8] sm:$0xff] %v377_v1  ;;  %s1056_s3 = sshra.s32 %s396_s17, 4  ;;  %s1062_s23 = scalar_lea.hbm %s1433_s2, 48  ;;  %s1057_s3 = int_to_ptr.hbm [resolvable:$true] %s1056_s3 }
 0x10b   : > { %s1058_s12 = scalar_lea.hbm %s1057_s3, 16  ;;  %p1063_p7 = scmp.lt.s32.totalorder %s1057_s3, %s1433_s2 }
 0x10c   : > { %p1059_p2 = scmp.ne.s32.totalorder %s1057_s3, %s1058_s12  ;;  %p1064_p8 = scmp.lt.s32.totalorder %s1062_s23, %s1058_s12 }
 0x10e   : > { %p1060_p3 = pnand %p1059_p2, %p1197_p4  ;;  %p1065_p9 = por %p1064_p8, %p1063_p7 }
 0x110   : > { %p1061_p5 = pneg %p1060_p3 }
 0x112   : > { %p1066_p10 = pnand %p1065_p9, %p1061_p5 }
 0x114   : > { %1069 = shalt.err (!%p1066_p10)
}
 0x115   : > { %s1149_s22 = smov 128   ;;  %s1150_s6 = smov 8  }
 0x116   : > { %596 = dma.vmem_to_hbm [thread:$0]  (%p1197_p4), %s394_s0, 256, %s396_s17, %s381_s30, %s1149_s22, %s1149_s22, %s1150_s6  }
 0x117 PF: > { %p602_p11 = scmp.ge.s32.totalorder %s1130_s15, 1  ;;  %s410_s10 = sand.u32 1, %s1122_s13  }
 0x118   : > { %s411_s4 = scalar_lea.sflag [#allocation7], %s410_s10 }
 0x119   : > { %p599_p12 = pnand %p602_p11, %p1201_p6 }
 0x11b   : > { %p600_p13 = pneg %p599_p12 }
 0x11d   : > { %1117 = dma.done.wait (%p600_p13), %s411_s4, 256  }
 0x11e   : > { %1119 = vsyncadd (%p600_p13), %s411_s4, 4294967040  ;;  %p20_p0 = scmp.ge.s32.totalorder %s1186_s16, 4   ;;  %s1436_s13 = smov %s1126_s14 }
 0x11f   : > { %s1437_s14 = smov %s1195_s19  ;;  %s1438_s15 = smov %s1186_s16 }
 0x120   :  { %22 = sbr.rel (!%p20_p0) target bundleno = 9 (0x9), region = 169 }
 0x125   :  { %417 = vsyncpa [#allocation7], 1 }
 0x126   :  { %419 = vsyncpa [#allocation7 + $0x1], 1 }
 0x127   :  { %420 = vsyncmov [#allocation3] }
 0x12a   :  { %s421_s15 = vpop.sfrf %420 }
 0x12b   :  { %p579_p4 = scmp.ne.s32.totalorder %s421_s15, 0 }
 0x12d   :  { %425 = shalt.err (%p579_p4)  }
 0x12e   :  { %427 = vsyncmov [#allocation3 + $0x1] }
 0x131   :  { %s428_s20 = vpop.sfrf %427 }
 0x132   :  { %p580_p6 = scmp.ne.s32.totalorder %s428_s20, 0 }
 0x134   :  { %432 = shalt.err (%p580_p6)  }
 0x135   :  { %434 = vsyncmov [#allocation3 + $0x2] }
 0x138   :  { %s435_s21 = vpop.sfrf %434 }
 0x139   :  { %p581_p1 = scmp.ne.s32.totalorder %s435_s21, 0 }
 0x13b   :  { %439 = shalt.err (%p581_p1)  }
 0x13c   :  { %441 = vsyncmov [#allocation3 + $0x3] }
 0x13f   :  { %s442_s28 = vpop.sfrf %441 }
 0x140   :  { %p582_p2 = scmp.ne.s32.totalorder %s442_s28, 0 }
 0x142   :  { %446 = shalt.err (%p582_p2)  }
 0x143   :  { %448 = vsyncmov [#allocation3 + $0x4] }
 0x146   :  { %s449_s16 = vpop.sfrf %448 }
 0x147   :  { %p583_p3 = scmp.ne.s32.totalorder %s449_s16, 0 }
 0x149   :  { %453 = shalt.err (%p583_p3)  }
 0x14a   :  { %455 = vsyncmov [#allocation3 + $0x5] }
 0x14d   :  { %s456_s1 = vpop.sfrf %455 }
 0x14e   :  { %p584_p5 = scmp.ne.s32.totalorder %s456_s1, 0 }
 0x150   :  { %460 = shalt.err (%p584_p5)  }
 0x151   :  { %462 = vsyncmov [#allocation3 + $0x6] }
 0x154   :  { %s463_s2 = vpop.sfrf %462 }
 0x155   :  { %p585_p7 = scmp.ne.s32.totalorder %s463_s2, 0 }
 0x157   :  { %467 = shalt.err (%p585_p7)  }
 0x158   :  { %469 = vsyncmov [#allocation3 + $0x7] }
 0x15b   :  { %s470_s13 = vpop.sfrf %469 }
 0x15c   :  { %p586_p8 = scmp.ne.s32.totalorder %s470_s13, 0 }
 0x15e   :  { %474 = shalt.err (%p586_p8)  }
 0x15f   :  { %476 = vsyncmov [#allocation3 + $0x8] }
 0x162   :  { %s477_s14 = vpop.sfrf %476 }
 0x163   :  { %p587_p9 = scmp.ne.s32.totalorder %s477_s14, 0 }
 0x165   :  { %481 = shalt.err (%p587_p9)  }
 0x166   :  { %483 = vsyncmov [#allocation3 + $0x9] }
 0x169   :  { %s484_s19 = vpop.sfrf %483 }
 0x16a   :  { %p588_p10 = scmp.ne.s32.totalorder %s484_s19, 0 }
 0x16c   :  { %488 = shalt.err (%p588_p10)  }
 0x16d   :  { %490 = vsyncmov [#allocation3 + $0xa] }
 0x170   :  { %s491_s11 = vpop.sfrf %490 }
 0x171   :  { %p589_p11 = scmp.ne.s32.totalorder %s491_s11, 0 }
 0x173   :  { %495 = shalt.err (%p589_p11)  }
 0x174   :  { %497 = vsyncmov [#allocation3 + $0xb] }
 0x177   :  { %s498_s7 = vpop.sfrf %497 }
 0x178   :  { %p590_p12 = scmp.ne.s32.totalorder %s498_s7, 0 }
 0x17a   :  { %502 = shalt.err (%p590_p12)  }
 0x17b   :  { %504 = vsyncmov [#allocation3 + $0xc] }
 0x17e   :  { %s505_s27 = vpop.sfrf %504 }
 0x17f   :  { %p591_p13 = scmp.ne.s32.totalorder %s505_s27, 0 }
 0x181   :  { %509 = shalt.err (%p591_p13)  }
 0x182   :  { %511 = vsyncmov [#allocation3 + $0xd] }
 0x185   :  { %s512_s5 = vpop.sfrf %511 }
 0x186   :  { %p592_p0 = scmp.ne.s32.totalorder %s512_s5, 0 }
 0x188   :  { %516 = shalt.err (%p592_p0)  }
 0x189   :  { %518 = vsyncmov [#allocation3 + $0xe] }
 0x18c   :  { %s519_s24 = vpop.sfrf %518 }
 0x18d   :  { %p593_p4 = scmp.ne.s32.totalorder %s519_s24, 0 }
 0x18f   :  { %523 = shalt.err (%p593_p4)  }
 0x190   :  { %525 = vsyncmov [#allocation3 + $0xf] }
 0x193   :  { %s526_s26 = vpop.sfrf %525 }
 0x194   :  { %p594_p6 = scmp.ne.s32.totalorder %s526_s26, 0 }
 0x196   :  { %530 = shalt.err (%p594_p6)  }

</bundles_post_ra>
